<compile_context>
chip_gen: v7x
topology: tpu7x:2x2x1
jax: 0.10.0
libtpu: 0.0.40
codegen_flags: <defaults>
</compile_context>

<pallas_src>
import functools

import jax
import jax.numpy as jnp
from jax.experimental import pallas as pl
from jax.experimental.pallas import tpu as pltpu


def _coral_loss_kernel(logits_ref, thr_ref, out_ref, acc_ref, *,
                       tile_cols, n_valid_cols, n_inner, inv_denom):
    """One grid step over a lane-dense (R, tile_cols) tile.

    logits_ref : (R, tile_cols) block, input dtype (sublane-packed batch/class)
    thr_ref    : (R, tile_cols) int8/int32 block, thr > 0  <=>  extended target == 1
    out_ref    : (1, 128) f32 partial-result row for this outer grid slice
    acc_ref    : (R, tile_cols) f32 VMEM scratch, elementwise partial sums
    """
    o = pl.program_id(0)          # outer (parallel) slice
    i = pl.program_id(1)          # inner (reduction) step within the slice

    @pl.when(i == 0)
    def _init():
        acc_ref[...] = jnp.zeros_like(acc_ref)

    # In-kernel upcast: HBM traffic stays at the input dtype (e.g. bf16).
    x = logits_ref[...].astype(jnp.float32)
    y_pos = thr_ref[...].astype(jnp.int32) > 0          # extended target == 1

    # Numerically stable BCE-with-logits; x*y replaced by a select (review #6).
    per_elem = (jnp.maximum(x, 0.0)
                - jnp.where(y_pos, x, 0.0)
                + jnp.log(1.0 + jnp.exp(-jnp.abs(x))))

    # Logical column-block index (may be a phantom block past the real grid;
    # the input index_map clamps the DMA, masking below zeroes its contribution).
    blk = o * n_inner + i
    start = blk * tile_cols
    is_full = start + tile_cols <= n_valid_cols

    # Full blocks skip the mask entirely (review #5).
    @pl.when(is_full)
    def _acc_full():
        acc_ref[...] += per_elem

    @pl.when(jnp.logical_not(is_full))
    def _acc_masked():
        col = jax.lax.broadcasted_iota(jnp.int32, per_elem.shape, 1) + start
        acc_ref[...] += jnp.where(col < n_valid_cols, per_elem, 0.0)

    # Single cross-lane/sublane reduce per outer slice, paid once at the end.
    @pl.when(i == n_inner - 1)
    def _finalize():
        total = jnp.sum(acc_ref[...]) * inv_denom
        out_ref[...] = jnp.broadcast_to(total, out_ref.shape).astype(jnp.float32)


def coral_loss(logits: jax.Array, targets: jax.Array, *,
               lane_tile: int = 32768,
               vmem_budget_bytes: int = 12 * 1024 * 1024) -> jax.Array:
    """logits: (B, K-1) float; targets: (B,) int in [0, K-1]. Returns scalar f32."""
    B, Km1 = logits.shape

    # --- sublane packing factor (review #3): fold G batch groups onto sublanes
    # so the f32 compute tile fills all 8 sublanes. Fall back to G=1 if Km1
    # does not divide 8 or B is not a multiple of G (no wrapper pad, review #4/#10).
    if Km1 <= 8 and 8 % Km1 == 0 and B % (8 // Km1) == 0:
        G = 8 // Km1
    else:
        G = 1
    R = G * Km1                 # sublane rows of the packed layout
    C = B // G                  # lane columns of the packed layout

    in_itemsize = logits.dtype.itemsize
    thr_dtype = jnp.int8 if Km1 <= 127 else jnp.int32
    thr_itemsize = jnp.dtype(thr_dtype).itemsize

    # --- column-tile sizing (review #1/#2): big tiles, budgeted against VMEM
    # (2x double-buffered logits + 2x thr + f32 accumulator), portable to v7x.
    per_col_bytes = R * (2 * in_itemsize + 2 * thr_itemsize + 4)
    max_cols = max(128, (vmem_budget_bytes // per_col_bytes) // 128 * 128)
    lane_tile = max(128, (lane_tile // 128) * 128)
    tile_cols = min(lane_tile, max_cols)
    if C <= tile_cols:
        tile_cols = C           # full-extent last dim: always a legal block shape
    nb = pl.cdiv(C, tile_cols)  # real number of column blocks

    # --- 2-way parallel outer axis (review #7): per-slice partial outputs.
    n_par = 2 if nb >= 2 else 1
    n_inner = pl.cdiv(nb, n_par)

    # --- single relayout pass (review #10): (B, Km1) -> (R, C) with
    # x_packed[g*Km1 + k, c] = logits[c*G + g, k]
    x_p = logits.reshape(C, G, Km1).transpose(1, 2, 0).reshape(R, C)

    # Pre-expanded int8 target thresholds (reviews #3/#6/#8):
    # thr_packed[g*Km1 + k, c] = targets[c*G + g] - k   (>0  <=>  y == 1)
    k_idx = jnp.arange(Km1, dtype=jnp.int32)
    thr = targets.astype(jnp.int32)[:, None] - k_idx[None, :]          # (B, Km1)
    thr_p = thr.reshape(C, G, Km1).transpose(1, 2, 0).reshape(R, C).astype(thr_dtype)

    kernel = functools.partial(
        _coral_loss_kernel,
        tile_cols=tile_cols, n_valid_cols=C, n_inner=n_inner,
        inv_denom=1.0 / float(B * Km1))

    def col_block(o, i):
        # Clamp phantom blocks (nb not a multiple of n_par) onto the last real
        # block so the auto-DMA never goes fully out of bounds; the in-kernel
        # mask zeroes their contribution.
        return jnp.minimum(o * n_inner + i, nb - 1)

    grid_spec = pltpu.PrefetchScalarGridSpec(
        num_scalar_prefetch=0,
        grid=(n_par, n_inner),
        in_specs=[
            pl.BlockSpec((R, tile_cols), lambda o, i: (0, col_block(o, i))),
            pl.BlockSpec((R, tile_cols), lambda o, i: (0, col_block(o, i))),
        ],
        out_specs=pl.BlockSpec((1, 128), lambda o, i: (o, 0)),
        scratch_shapes=[pltpu.VMEM((R, tile_cols), jnp.float32)],
    )

    cost = pl.CostEstimate(
        flops=7 * B * Km1,
        transcendentals=2 * B * Km1,
        bytes_accessed=int(x_p.size) * in_itemsize
                       + int(thr_p.size) * thr_itemsize
                       + n_par * 128 * 4,
    )

    out = pl.pallas_call(
        kernel,
        out_shape=jax.ShapeDtypeStruct((n_par, 128), jnp.float32),
        grid_spec=grid_spec,
        compiler_params=pltpu.CompilerParams(
            dimension_semantics=("parallel", "arbitrary"),
            vmem_limit_bytes=32 * 1024 * 1024,
        ),
        cost_estimate=cost,
    )(x_p, thr_p)

    # Tiny trailing reduce of the per-slice partials (2 numbers) in plain JAX.
    return jnp.sum(out[:, 0])


def coral_loss_ref(logits, targets):
    """Pure-JAX reference (mirrors the torch module exactly)."""
    B, Km1 = logits.shape
    col = jnp.arange(Km1, dtype=jnp.int32)[None, :]
    y = (col < targets.astype(jnp.int32)[:, None]).astype(jnp.float32)
    x = logits.astype(jnp.float32)
    per_elem = jnp.maximum(x, 0.0) - x * y + jnp.log1p(jnp.exp(-jnp.abs(x)))
    return jnp.mean(per_elem)


if __name__ == "__main__":
    key = jax.random.PRNGKey(0)
    ks = jax.random.split(key, 6)

    num_classes = 5
    Km1 = num_classes - 1

    # Test 1: tiny batch, single block, sublane-packed (G=2), f32 logits.
    B = 8
    logits = jax.random.normal(ks[0], (B, Km1), dtype=jnp.float32)
    targets = jax.random.randint(ks[1], (B,), 0, num_classes, dtype=jnp.int32)
    loss = coral_loss(logits, targets)
    jax.block_until_ready(loss)
    ref = coral_loss_ref(logits, targets)
    assert jnp.allclose(loss, ref, atol=1e-5, rtol=1e-5), (loss, ref)

    # Test 2: bf16 logits, small lane tile to force a multi-block grid with a
    # ragged last block and a phantom (clamped+masked) megacore block.
    B2 = 666
    logits2 = jax.random.normal(ks[2], (B2, Km1)).astype(jnp.bfloat16)
    targets2 = jax.random.randint(ks[3], (B2,), 0, num_classes, dtype=jnp.int32)
    loss2 = coral_loss(logits2, targets2, lane_tile=128)
    jax.block_until_ready(loss2)
    ref2 = coral_loss_ref(logits2, targets2)
    assert jnp.allclose(loss2, ref2, atol=2e-3, rtol=2e-3), (loss2, ref2)

    # Test 3: no-packing fallback (odd batch, K-1 that does not divide 8).
    B3, nc3 = 77, 7
    logits3 = jax.random.normal(ks[4], (B3, nc3 - 1), dtype=jnp.float32)
    targets3 = jax.random.randint(ks[5], (B3,), 0, nc3, dtype=jnp.int32)
    loss3 = coral_loss(logits3, targets3)
    jax.block_until_ready(loss3)
    ref3 = coral_loss_ref(logits3, targets3)
    assert jnp.allclose(loss3, ref3, atol=1e-5, rtol=1e-5), (loss3, ref3)

    print("KERNEL_OK")
</pallas_src>

<mosaic_0001>
module attributes {stable_mosaic.version = 11 : i64} {
  func.func @_coral_loss_kernel(%arg0: i32, %arg1: i32, %arg2: memref<8x4xf32, #tpu.memory_space<vmem>>, %arg3: memref<8x4xi8, #tpu.memory_space<vmem>>, %arg4: memref<1x128xf32, #tpu.memory_space<vmem>>, %arg5: memref<8x4xf32, #tpu.memory_space<vmem>>) attributes {dimension_semantics = [#tpu.dimension_semantics<parallel>, #tpu.dimension_semantics<arbitrary>], iteration_bounds = array<i64: 1, 1>, scalar_prefetch = 0 : i64, scratch_operands = 1 : i64, tpu.core_type = #tpu.core_type<tc>, window_params = [{transform_indices = @transform_0, window_bounds = array<i64: 8, 4>}, {transform_indices = @transform_1, window_bounds = array<i64: 8, 4>}, {transform_indices = @transform_2, window_bounds = array<i64: 1, 128>}]} {
    %c0_i32 = arith.constant 0 : i32
    %0 = arith.cmpi eq, %arg1, %c0_i32 : i32
    %1 = arith.extui %0 : i1 to i32
    %c0_i32_0 = arith.constant 0 : i32
    %2 = arith.cmpi ne, %1, %c0_i32_0 : i32
    scf.if %2 {
      %cst_14 = arith.constant 0.000000e+00 : f32
      %34 = vector.broadcast %cst_14 : f32 to vector<8x4xf32>
      %c0_15 = arith.constant 0 : index
      %c0_16 = arith.constant 0 : index
      %35 = vector.load %arg5[%c0_15, %c0_16] : memref<8x4xf32, #tpu.memory_space<vmem>>, vector<8x4xf32>
      tpu.vector_store %arg5[%c0_15, %c0_16], %34 {strides = array<i32>} : memref<8x4xf32, #tpu.memory_space<vmem>>, vector<8x4xf32>,
    } else {
    }
    %c0 = arith.constant 0 : index
    %c0_1 = arith.constant 0 : index
    %3 = vector.load %arg2[%c0, %c0_1] : memref<8x4xf32, #tpu.memory_space<vmem>>, vector<8x4xf32>
    %c0_2 = arith.constant 0 : index
    %c0_3 = arith.constant 0 : index
    %4 = vector.load %arg3[%c0_2, %c0_3] : memref<8x4xi8, #tpu.memory_space<vmem>>, vector<8x4xi8>
    %5 = arith.extsi %4 : vector<8x4xi8> to vector<8x4xi32>
    %c0_i32_4 = arith.constant 0 : i32
    %6 = vector.broadcast %c0_i32_4 : i32 to vector<8x4xi32>
    %7 = arith.cmpi sgt, %5, %6 : vector<8x4xi32>
    %cst = arith.constant 0.000000e+00 : f32
    %8 = vector.broadcast %cst : f32 to vector<8x4xf32>
    %9 = arith.maximumf %3, %8 : vector<8x4xf32>
    %cst_5 = arith.constant 0.000000e+00 : f32
    %10 = vector.broadcast %cst_5 : f32 to vector<8x4xf32>
    %11 = arith.select %7, %3, %10 : vector<8x4xi1>, vector<8x4xf32>
    %12 = arith.subf %9, %11 : vector<8x4xf32>
    %13 = math.absf %3 : vector<8x4xf32>
    %cst_6 = arith.constant 0.000000e+00 : f32
    %14 = vector.broadcast %cst_6 : f32 to vector<8x4xf32>
    %15 = arith.subf %14, %13 : vector<8x4xf32>
    %16 = math.exp %15 : vector<8x4xf32>
    %cst_7 = arith.constant 1.000000e+00 : f32
    %17 = vector.broadcast %cst_7 : f32 to vector<8x4xf32>
    %18 = arith.addf %17, %16 : vector<8x4xf32>
    %19 = math.log %18 : vector<8x4xf32>
    %20 = arith.addf %12, %19 : vector<8x4xf32>
    %c1_i32 = arith.constant 1 : i32
    %21 = arith.muli %arg0, %c1_i32 : i32
    %22 = arith.addi %21, %arg1 : i32
    %c4_i32 = arith.constant 4 : i32
    %23 = arith.muli %22, %c4_i32 : i32
    %c4_i32_8 = arith.constant 4 : i32
    %24 = arith.addi %23, %c4_i32_8 : i32
    %c4_i32_9 = arith.constant 4 : i32
    %25 = arith.cmpi sle, %24, %c4_i32_9 : i32
    %26 = arith.extui %25 : i1 to i32
    %c0_i32_10 = arith.constant 0 : i32
    %27 = arith.cmpi ne, %26, %c0_i32_10 : i32
    scf.if %27 {
      %c0_14 = arith.constant 0 : index
      %c0_15 = arith.constant 0 : index
      %34 = vector.load %arg5[%c0_14, %c0_15] : memref<8x4xf32, #tpu.memory_space<vmem>>, vector<8x4xf32>
      %35 = arith.addf %34, %20 : vector<8x4xf32>
      %c0_16 = arith.constant 0 : index
      %c0_17 = arith.constant 0 : index
      %36 = vector.load %arg5[%c0_16, %c0_17] : memref<8x4xf32, #tpu.memory_space<vmem>>, vector<8x4xf32>
      tpu.vector_store %arg5[%c0_16, %c0_17], %35 {strides = array<i32>} : memref<8x4xf32, #tpu.memory_space<vmem>>, vector<8x4xf32>,
    } else {
    }
    %true = arith.constant true
    %28 = arith.xori %25, %true : i1
    %29 = arith.extui %28 : i1 to i32
    %c0_i32_11 = arith.constant 0 : i32
    %30 = arith.cmpi ne, %29, %c0_i32_11 : i32
    scf.if %30 {
      %34 = tpu.iota {dimensions = array<i32: 1>} : vector<8x4xi32>
      %35 = vector.broadcast %23 : i32 to vector<8x4xi32>
      %36 = arith.addi %34, %35 : vector<8x4xi32>
      %c0_14 = arith.constant 0 : index
      %c0_15 = arith.constant 0 : index
      %37 = vector.load %arg5[%c0_14, %c0_15] : memref<8x4xf32, #tpu.memory_space<vmem>>, vector<8x4xf32>
      %c4_i32_16 = arith.constant 4 : i32
      %38 = vector.broadcast %c4_i32_16 : i32 to vector<8x4xi32>
      %39 = arith.cmpi slt, %36, %38 : vector<8x4xi32>
      %cst_17 = arith.constant 0.000000e+00 : f32
      %40 = vector.broadcast %cst_17 : f32 to vector<8x4xf32>
      %41 = arith.select %39, %20, %40 : vector<8x4xi1>, vector<8x4xf32>
      %42 = arith.addf %37, %41 : vector<8x4xf32>
      %c0_18 = arith.constant 0 : index
      %c0_19 = arith.constant 0 : index
      %43 = vector.load %arg5[%c0_18, %c0_19] : memref<8x4xf32, #tpu.memory_space<vmem>>, vector<8x4xf32>
      tpu.vector_store %arg5[%c0_18, %c0_19], %42 {strides = array<i32>} : memref<8x4xf32, #tpu.memory_space<vmem>>, vector<8x4xf32>,
    } else {
    }
    %c0_i32_12 = arith.constant 0 : i32
    %31 = arith.cmpi eq, %arg1, %c0_i32_12 : i32
    %32 = arith.extui %31 : i1 to i32
    %c0_i32_13 = arith.constant 0 : i32
    %33 = arith.cmpi ne, %32, %c0_i32_13 : i32
    scf.if %33 {
      %c0_14 = arith.constant 0 : index
      %c0_15 = arith.constant 0 : index
      %34 = vector.load %arg5[%c0_14, %c0_15] : memref<8x4xf32, #tpu.memory_space<vmem>>, vector<8x4xf32>
      %35 = vector.shape_cast %34 : vector<8x4xf32> to vector<1x8x4xf32>
      %cst_16 = arith.constant dense<0.000000e+00> : vector<1xf32>
      %36 = vector.multi_reduction <add>, %35, %cst_16 [1, 2] : vector<1x8x4xf32> to vector<1xf32>
      %37 = vector.shape_cast %36 : vector<1xf32> to vector<1x1x1xf32>
      %38 = vector.extract %37[0, 0, 0] : f32 from vector<1x1x1xf32>
      %cst_17 = arith.constant 3.125000e-02 : f32
      %39 = arith.mulf %38, %cst_17 : f32
      %40 = vector.broadcast %39 : f32 to vector<1x128xf32>
      %c0_18 = arith.constant 0 : index
      %c0_19 = arith.constant 0 : index
      %41 = vector.load %arg4[%c0_18, %c0_19] : memref<1x128xf32, #tpu.memory_space<vmem>>, vector<1x128xf32>
      tpu.vector_store %arg4[%c0_18, %c0_19], %40 {strides = array<i32>} : memref<1x128xf32, #tpu.memory_space<vmem>>, vector<1x128xf32>,
    } else {
    }
    return
  }
  func.func @transform_0(%arg0: i32, %arg1: i32) -> (i32, i32) {
    %c1_i32 = arith.constant 1 : i32
    %0 = arith.muli %arg0, %c1_i32 : i32
    %1 = arith.addi %0, %arg1 : i32
    %c0_i32 = arith.constant 0 : i32
    %2 = arith.minsi %1, %c0_i32 : i32
    %c0_i32_0 = arith.constant 0 : i32
    %c0_i32_1 = arith.constant 0 : i32
    return %c0_i32_0, %2 : i32, i32
  }
  func.func @transform_1(%arg0: i32, %arg1: i32) -> (i32, i32) {
    %c1_i32 = arith.constant 1 : i32
    %0 = arith.muli %arg0, %c1_i32 : i32
    %1 = arith.addi %0, %arg1 : i32
    %c0_i32 = arith.constant 0 : i32
    %2 = arith.minsi %1, %c0_i32 : i32
    %c0_i32_0 = arith.constant 0 : i32
    %c0_i32_1 = arith.constant 0 : i32
    return %c0_i32_0, %2 : i32, i32
  }
  func.func @transform_2(%arg0: i32, %arg1: i32) -> (i32, i32) {
    %c0_i32 = arith.constant 0 : i32
    %c0_i32_0 = arith.constant 0 : i32
    return %arg0, %c0_i32 : i32, i32
  }
}

</mosaic_0001>

<bundles_post_ra>
// kernel: tpu_custom_call.1
= control target key start
LH: loop header
LB: loop body
LE: loop exit
PB: predicated region body
PF: predicated region fallthrough
CT: control target
= control target key end

     0   :  { %vm70_vm0 = vcmask 31744   ;;  %v188_v1 = vmov 0.0   ;;  %s226_s0 = inlined_call_operand.vmem [shape: f32[8,4], index: 0, kind: input, shape index: {}]   ;;  %s227_s1 = inlined_call_operand.vmem [shape: s8[8,4], index: 1, kind: input, shape index: {}]   ;;  %s228_s2 = inlined_call_operand.hbm [shape: f32[1,128], index: 2, kind: output, shape index: {}]  }
   0x1   :  { %v72_v0 = vld [vmem:[%s226_s0] sm:$0xff]  ;;  %71 = vst.msk [vmem:[#allocation2] sm:$0xff] %vm70_vm0, %v188_v1 }
   0x2   :  { %v79_v2 = vand.u32 2147483647, %v72_v0 }
   0x3   :  { %7 = vsyncpa [#allocation4], 0  ;;  %v73_v5 = vld [vmem:[%s227_s1] sm:$0x3]  ;;  %v76_v9 = vmax.f32 %v72_v0, 0.0  ;;  %s189_s0 = smov [#allocation3]  }
   0x4   :  { %v80_v3 = vsub.f32 0.0, %v79_v2  ;;  %v74_v8 = vunpack.c.0.s8 %v73_v5  ;;  %s136_s1 = sshll.u32 %s189_s0, 4  ;;  %s137_s1 = int_to_ptr.vmem [resolvable:$true] %s136_s1 }
   0x5   :  { %s164_s15 = scalar_lea.vmem %s137_s1, 16  ;;  %s168_s16 = scalar_lea.vmem %s137_s1, 32 }
   0x6   :  { %v81_v4 = vmul.f32 1.442695, %v80_v3  ;;  %vm75_vm1 = vcmp.gt.s32.totalorder %v74_v8, 0  ;;  %p165_p0 = scmp.ne.s32.totalorder %s137_s1, %s164_s15  ;;  %p169_p1 = scmp.lt.s32.totalorder %s137_s1, %s137_s1 }
   0x7   :  { %v77_v10 = vsel %vm75_vm1, %v72_v0, 0.0  ;;  %p170_p2 = scmp.lt.s32.totalorder %s168_s16, %s164_s15 }
   0x8   :  { %160 = vpow2.f32 %v81_v4  ;;  %v78_v11 = vsub.f32 %v76_v9, %v77_v10  ;;  %v94_v14 = vld [vmem:[#allocation2] sm:$0xff] }
   0x9   :  { %p171_p3 = por %p170_p2, %p169_p1 }
   0xb   :  { %p172_p4 = pnand %p171_p3, %p165_p0 }
  0x12   :  { %v161_v6 = vpop.eup %160 }
  0x13   :  { %v83_v7 = vadd.f32 1.0, %v161_v6 }
  0x15   :  { %162 = vlog2.f32 %v83_v7 }
  0x1f   :  { %v163_v12 = vpop.eup %162 }
  0x20   :  { %v85_v13 = vmul.f32 0.6931472, %v163_v12 }
  0x22   :  { %v86_v15 = vadd.f32 %v85_v13, %v78_v11 }
  0x24   :  { %v95_v16 = vadd.f32 %v94_v14, %v86_v15 }
  0x26   :  { %97 = vst.msk [vmem:[#allocation2] sm:$0xff] %vm70_vm0, %v95_v16 }
  0x2d   :  { %v115_v17 = vld [vmem:[#allocation2] sm:$0xff] }
  0x2e   :  { %v117_v18 = vsel %vm70_vm0, %v115_v17, 0.0 }
  0x2f   :  { %118 = vadd.xlane.f32.xlu0 %v117_v18 }
  0xbc   :  { %v119_v19 = vpop.xlane.xlu0 %118 }
  0xbd   :  { %v120_v20 = vrot.slane %v119_v19, 4 }
  0xbf   :  { %v121_v21 = vadd.f32 %v120_v20, %v119_v19 }
  0xc1   :  { %v122_v22 = vrot.slane %v121_v21, 2 }
  0xc3   :  { %v123_v23 = vadd.f32 %v122_v22, %v121_v21 }
  0xc5   :  { %v124_v24 = vrot.slane %v123_v23, 1 }
  0xc7   :  { %v125_v25 = vadd.f32 %v124_v24, %v123_v23 }
  0xc9   :  { %156 = vpush %v125_v25 }
  0xfa   :  { %s157_s13 = spop %156 }
  0xfb   :  { %s127_s14 = smul.f32 0.03125, %s157_s13 }
  0xfd   :  { %v128_v26 = vstv %s127_s14 }
  0xfe   :  { %129 = vst [vmem:[#allocation3] sm:$0x1] %v128_v26 }
  0xff   :  { %175 = shalt.err (!%p172_p4)
}
 0x100   :  { %s176_s19 = scalar_lea.hbm %s228_s2, 16 }
 0x101   :  { %p177_p5 = scmp.ne.s32.totalorder %s228_s2, %s176_s19  ;;  %p180_p6 = scmp.lt.u32.totalorder %s176_s19, %s228_s2 }
 0x103   :  { %p182_p7 = pnand %p180_p6, %p177_p5 }
 0x105   :  { %185 = shalt.err (!%p182_p7)
}
 0x106   :  { %139 = dma.vmem_to_hbm [thread:$0]  %s137_s1, 16, %s228_s2, [#allocation4]  }
 0x107   :  { %186 = dma.done.wait [#allocation4], 16  }
 0x108   :  { %187 = vsyncadd [#allocation4], 4294967280 }
 0x109   :  { %143 = vsyncpa [#allocation4], 1 }

</bundles_post_ra>
